<compile_context>
chip_gen: v6e
topology: v6e:2x2x1
jax: 0.10.0
libtpu: 0.0.40
codegen_flags: <defaults>
</compile_context>

<pallas_src>
import functools

import jax
import jax.numpy as jnp
from jax.experimental import pallas as pl
from jax.experimental.pallas import tpu as pltpu


def lstm_fc_kernel(x_ref, wih_ref, whh_ref, b_ref, wfc_ref, bfc_ref, out_ref, *,
                   seq_len):
    """Fused LSTM recurrence + final Linear. Single invocation (no grid).

    x_ref   : (S*B, D)   bf16, rows ordered TIME-major (row = t*B + b)
    wih_ref : (D, 4H)    bf16
    whh_ref : (H, 4H)    bf16
    b_ref   : (1, 4H)    f32   (b_ih + b_hh, pre-fused)
    wfc_ref : (H, O_pad) bf16  (zero-padded lanes)
    bfc_ref : (1, O_pad) f32
    out_ref : (B, O_pad) f32
    """
    S = seq_len
    B = out_ref.shape[0]
    H4 = whh_ref.shape[1]
    H = H4 // 4

    # --- hoisted input projection: one big MXU matmul, bias folded in --------
    gx = jnp.dot(x_ref[...], wih_ref[...], preferred_element_type=jnp.float32)
    gx = (gx + b_ref[...]).reshape(S, B, H4)          # (S, B, 4H) f32, time-major

    whh = whh_ref[...]                                # (H, 4H) bf16, resident

    # g-gate lane mask over [i | f | g | o]; fixup constants hoisted out of the
    # loop so the per-step cost is one VPU mul + one fma around ONE sigmoid pass.
    lane = jax.lax.broadcasted_iota(jnp.int32, (B, H4), 1)
    g_lane = (lane >= 2 * H) & (lane < 3 * H)
    pre_scale = jnp.where(g_lane, 2.0, 1.0).astype(jnp.float32)   # x  -> 2x  on g lanes
    post_mul = jnp.where(g_lane, 2.0, 1.0).astype(jnp.float32)    # s  -> 2s  on g lanes
    post_add = jnp.where(g_lane, -1.0, 0.0).astype(jnp.float32)   # 2s -> 2s-1 on g lanes

    def cell(gates, c):
        # Single full-tile EUP pass; tanh(g) recovered as 2*sigmoid(2g) - 1 (f32).
        s = jax.nn.sigmoid(gates * pre_scale)
        act = s * post_mul + post_add                  # [sig(i)|sig(f)|tanh(g)|sig(o)]
        i_g = act[:, 0 * H:1 * H]
        f_g = act[:, 1 * H:2 * H]
        g_g = act[:, 2 * H:3 * H]
        o_g = act[:, 3 * H:4 * H]
        c_new = f_g * c + i_g * g_g
        h_new = o_g * jnp.tanh(c_new)                  # narrow (B, H) EUP pass
        return h_new, c_new

    # --- t = 0: h == 0, so skip the recurrent matmul entirely ------------------
    h, c = cell(gx[0], jnp.zeros((B, H), jnp.float32))

    # --- t = 1..S-1: serial recurrence, fully unrolled (static S) --------------
    # Static indices -> gx[t] is a zero-cost (8,128) vreg slice each step.
    for t in range(1, S):
        gates = gx[t] + jnp.dot(h.astype(jnp.bfloat16), whh,
                                preferred_element_type=jnp.float32)
        h, c = cell(gates, c)

    # --- fc1(h_n[-1]) : single lane-dense (B, O_pad) store ---------------------
    out_ref[...] = (jnp.dot(h.astype(jnp.bfloat16), wfc_ref[...],
                            preferred_element_type=jnp.float32)
                    + bfc_ref[...]).astype(out_ref.dtype)


def lstm_model_forward(x, w_ih, w_hh, b_ih, b_hh, w_fc, b_fc):
    """x: (batch, seq, input_dim). Returns (batch, output_dim) float32 == fc1(h_n[-1])."""
    B, S, D = x.shape
    H4 = w_ih.shape[0]
    H = H4 // 4
    O = w_fc.shape[0]

    # Sublane-pad batch (>=8 rows) and lane-pad the fc output (multiple of 128).
    B_pad = max(8, -(-B // 8) * 8)
    O_pad = -(-O // 128) * 128

    # bf16 operands for the MXU; biases stay f32 (accumulation is f32 in-kernel).
    # TIME-major layout (row = t*B_pad + b) so the per-step gate slice inside the
    # kernel is a contiguous sublane block, not a strided gather.
    x_p = jnp.zeros((S, B_pad, D), jnp.bfloat16).at[:, :B].set(
        jnp.transpose(x, (1, 0, 2)).astype(jnp.bfloat16))
    x2d = x_p.reshape(S * B_pad, D)
    wih_t = jnp.transpose(w_ih).astype(jnp.bfloat16)         # (D, 4H)
    whh_t = jnp.transpose(w_hh).astype(jnp.bfloat16)         # (H, 4H)
    b = (b_ih + b_hh).astype(jnp.float32).reshape(1, H4)     # (1, 4H)
    wfc_t = jnp.zeros((H, O_pad), jnp.bfloat16).at[:, :O].set(
        jnp.transpose(w_fc).astype(jnp.bfloat16))            # (H, O_pad)
    bfc = jnp.zeros((1, O_pad), jnp.float32).at[:, :O].set(
        b_fc.astype(jnp.float32)[None, :])                   # (1, O_pad)

    vmem = pl.BlockSpec(memory_space=pltpu.MemorySpace.VMEM)
    out = pl.pallas_call(
        functools.partial(lstm_fc_kernel, seq_len=S),
        out_shape=jax.ShapeDtypeStruct((B_pad, O_pad), jnp.float32),
        in_specs=[vmem] * 6,
        out_specs=vmem,
        compiler_params=pltpu.CompilerParams(
            # Tiny footprint here; set explicitly (the scoped DEFAULT is only
            # 16 MiB on v5e / 32 MiB on v6e/v7x) so scaled hidden sizes are
            # budgeted rather than silently hitting the default wall.  Keep
            # <= ~48 MiB when targeting v7x (64 MiB physical VMEM per TC).
            vmem_limit_bytes=32 * 1024 * 1024),
    )(x2d, wih_t, whh_t, b, wfc_t, bfc)

    return out[:B, :O]


def lstm_model_reference(x, w_ih, w_hh, b_ih, b_hh, w_fc, b_fc):
    """Pure-JAX f32 reference mirroring torch.nn.LSTM (batch_first) + Linear."""
    B, S, D = x.shape
    H = w_hh.shape[1]

    def step(carry, x_t):
        h, c = carry
        gates = x_t @ w_ih.T + b_ih + h @ w_hh.T + b_hh
        i, f, g, o = jnp.split(gates, 4, axis=-1)
        i, f, o = jax.nn.sigmoid(i), jax.nn.sigmoid(f), jax.nn.sigmoid(o)
        g = jnp.tanh(g)
        c_new = f * c + i * g
        h_new = o * jnp.tanh(c_new)
        return (h_new, c_new), None

    h0 = jnp.zeros((B, H), jnp.float32)
    c0 = jnp.zeros((B, H), jnp.float32)
    (h_n, _), _ = jax.lax.scan(step, (h0, c0), jnp.transpose(x, (1, 0, 2)))
    return h_n @ w_fc.T + b_fc


if __name__ == "__main__":
    # Small shapes consistent with the module's forward: x (batch, seq, input_dim).
    batch, seq, input_dim, hidden_dim, output_dim = 2, 8, 16, 32, 8

    key = jax.random.PRNGKey(0)
    ks = jax.random.split(key, 7)
    scale = 1.0 / jnp.sqrt(hidden_dim)

    x = jax.random.normal(ks[0], (batch, seq, input_dim), jnp.float32)
    w_ih = jax.random.uniform(ks[1], (4 * hidden_dim, input_dim), jnp.float32,
                              -scale, scale)
    w_hh = jax.random.uniform(ks[2], (4 * hidden_dim, hidden_dim), jnp.float32,
                              -scale, scale)
    b_ih = jax.random.uniform(ks[3], (4 * hidden_dim,), jnp.float32, -scale, scale)
    b_hh = jax.random.uniform(ks[4], (4 * hidden_dim,), jnp.float32, -scale, scale)
    w_fc = jax.random.uniform(ks[5], (output_dim, hidden_dim), jnp.float32,
                              -scale, scale)
    b_fc = jax.random.uniform(ks[6], (output_dim,), jnp.float32, -scale, scale)

    out = lstm_model_forward(x, w_ih, w_hh, b_ih, b_hh, w_fc, b_fc)
    out = jax.block_until_ready(out)

    ref = lstm_model_reference(x, w_ih, w_hh, b_ih, b_hh, w_fc, b_fc)
    assert out.shape == (batch, output_dim)
    max_err = float(jnp.max(jnp.abs(out - ref)))
    # bf16 weights/inputs -> relaxed tolerance vs. the f32 reference.
    assert jnp.allclose(out, ref, rtol=2e-2, atol=2e-2), \
        f"mismatch vs reference (max abs err {max_err})"

    print("KERNEL_OK")
</pallas_src>

<mosaic_0001>
module attributes {stable_mosaic.version = 11 : i64} {
  func.func @lstm_fc_kernel(%arg0: memref<64x16xbf16, #tpu.memory_space<vmem>>, %arg1: memref<16x128xbf16, #tpu.memory_space<vmem>>, %arg2: memref<32x128xbf16, #tpu.memory_space<vmem>>, %arg3: memref<1x128xf32, #tpu.memory_space<vmem>>, %arg4: memref<32x128xbf16, #tpu.memory_space<vmem>>, %arg5: memref<1x128xf32, #tpu.memory_space<vmem>>, %arg6: memref<8x128xf32, #tpu.memory_space<vmem>>) attributes {dimension_semantics = [], scalar_prefetch = 0 : i64, scratch_operands = 0 : i64, tpu.core_type = #tpu.core_type<tc>} {
    %c0 = arith.constant 0 : index
    %c0_0 = arith.constant 0 : index
    %0 = vector.load %arg0[%c0, %c0_0] : memref<64x16xbf16, #tpu.memory_space<vmem>>, vector<64x16xbf16>
    %c0_1 = arith.constant 0 : index
    %c0_2 = arith.constant 0 : index
    %1 = vector.load %arg1[%c0_1, %c0_2] : memref<16x128xbf16, #tpu.memory_space<vmem>>, vector<16x128xbf16>
    %cst = arith.constant dense<0.000000e+00> : vector<64x128xf32>
    %2 = tpu.matmul %0, %1, %cst {dimension_numbers = #tpu.dot_dimension_numbers<[1], [0], [0], [1], [0, 0, 1, 1], [], []>} : vector<64x16xbf16>, vector<16x128xbf16>, vector<64x128xf32> -> vector<64x128xf32>
    %c0_3 = arith.constant 0 : index
    %c0_4 = arith.constant 0 : index
    %3 = vector.load %arg3[%c0_3, %c0_4] : memref<1x128xf32, #tpu.memory_space<vmem>>, vector<1x128xf32>
    %4 = vector.broadcast %3 : vector<1x128xf32> to vector<64x128xf32>
    %5 = arith.addf %2, %4 : vector<64x128xf32>
    %6 = vector.shape_cast %5 : vector<64x128xf32> to vector<8x8x128xf32>
    %c0_5 = arith.constant 0 : index
    %c0_6 = arith.constant 0 : index
    %7 = vector.load %arg2[%c0_5, %c0_6] : memref<32x128xbf16, #tpu.memory_space<vmem>>, vector<32x128xbf16>
    %8 = tpu.iota {dimensions = array<i32: 1>} : vector<8x128xi32>
    %c64_i32 = arith.constant 64 : i32
    %9 = vector.broadcast %c64_i32 : i32 to vector<8x128xi32>
    %10 = arith.cmpi sge, %8, %9 : vector<8x128xi32>
    %c96_i32 = arith.constant 96 : i32
    %11 = vector.broadcast %c96_i32 : i32 to vector<8x128xi32>
    %12 = arith.cmpi slt, %8, %11 : vector<8x128xi32>
    %13 = arith.andi %10, %12 : vector<8x128xi1>
    %cst_7 = arith.constant 2.000000e+00 : f32
    %cst_8 = arith.constant 1.000000e+00 : f32
    %14 = vector.broadcast %cst_7 : f32 to vector<8x128xf32>
    %15 = vector.broadcast %cst_8 : f32 to vector<8x128xf32>
    %16 = arith.select %13, %14, %15 : vector<8x128xi1>, vector<8x128xf32>
    %cst_9 = arith.constant 2.000000e+00 : f32
    %cst_10 = arith.constant 1.000000e+00 : f32
    %17 = vector.broadcast %cst_9 : f32 to vector<8x128xf32>
    %18 = vector.broadcast %cst_10 : f32 to vector<8x128xf32>
    %19 = arith.select %13, %17, %18 : vector<8x128xi1>, vector<8x128xf32>
    %cst_11 = arith.constant -1.000000e+00 : f32
    %cst_12 = arith.constant 0.000000e+00 : f32
    %20 = vector.broadcast %cst_11 : f32 to vector<8x128xf32>
    %21 = vector.broadcast %cst_12 : f32 to vector<8x128xf32>
    %22 = arith.select %13, %20, %21 : vector<8x128xi1>, vector<8x128xf32>
    %23 = vector.extract_strided_slice %6 {offsets = [0, 0, 0], sizes = [1, 8, 128], strides = [1, 1, 1]} : vector<8x8x128xf32> to vector<1x8x128xf32>
    %24 = vector.shape_cast %23 : vector<1x8x128xf32> to vector<8x128xf32>
    %cst_13 = arith.constant 0.000000e+00 : f32
    %25 = vector.broadcast %cst_13 : f32 to vector<8x32xf32>
    %26 = arith.mulf %24, %16 : vector<8x128xf32>
    %27 = arith.negf %26 : vector<8x128xf32>
    %28 = math.exp %27 : vector<8x128xf32>
    %cst_14 = arith.constant 1.000000e+00 : f32
    %29 = vector.broadcast %cst_14 : f32 to vector<8x128xf32>
    %30 = arith.addf %29, %28 : vector<8x128xf32>
    %31 = arith.divf %29, %30 : vector<8x128xf32>
    %32 = arith.mulf %31, %19 : vector<8x128xf32>
    %33 = arith.addf %32, %22 : vector<8x128xf32>
    %34 = vector.extract_strided_slice %33 {offsets = [0, 0], sizes = [8, 32], strides = [1, 1]} : vector<8x128xf32> to vector<8x32xf32>
    %35 = vector.extract_strided_slice %33 {offsets = [0, 32], sizes = [8, 32], strides = [1, 1]} : vector<8x128xf32> to vector<8x32xf32>
    %36 = vector.extract_strided_slice %33 {offsets = [0, 64], sizes = [8, 32], strides = [1, 1]} : vector<8x128xf32> to vector<8x32xf32>
    %37 = vector.extract_strided_slice %33 {offsets = [0, 96], sizes = [8, 32], strides = [1, 1]} : vector<8x128xf32> to vector<8x32xf32>
    %38 = arith.mulf %35, %25 : vector<8x32xf32>
    %39 = arith.mulf %34, %36 : vector<8x32xf32>
    %40 = arith.addf %38, %39 : vector<8x32xf32>
    %41 = math.tanh %40 : vector<8x32xf32>
    %42 = arith.mulf %37, %41 : vector<8x32xf32>
    %43 = vector.extract_strided_slice %6 {offsets = [1, 0, 0], sizes = [1, 8, 128], strides = [1, 1, 1]} : vector<8x8x128xf32> to vector<1x8x128xf32>
    %44 = vector.shape_cast %43 : vector<1x8x128xf32> to vector<8x128xf32>
    %45 = arith.truncf %42 : vector<8x32xf32> to vector<8x32xbf16>
    %cst_15 = arith.constant dense<0.000000e+00> : vector<8x128xf32>
    %46 = tpu.matmul %45, %7, %cst_15 {dimension_numbers = #tpu.dot_dimension_numbers<[1], [0], [0], [1], [0, 0, 1, 1], [], []>} : vector<8x32xbf16>, vector<32x128xbf16>, vector<8x128xf32> -> vector<8x128xf32>
    %47 = arith.addf %44, %46 : vector<8x128xf32>
    %48 = arith.mulf %47, %16 : vector<8x128xf32>
    %49 = arith.negf %48 : vector<8x128xf32>
    %50 = math.exp %49 : vector<8x128xf32>
    %cst_16 = arith.constant 1.000000e+00 : f32
    %51 = vector.broadcast %cst_16 : f32 to vector<8x128xf32>
    %52 = arith.addf %51, %50 : vector<8x128xf32>
    %53 = arith.divf %51, %52 : vector<8x128xf32>
    %54 = arith.mulf %53, %19 : vector<8x128xf32>
    %55 = arith.addf %54, %22 : vector<8x128xf32>
    %56 = vector.extract_strided_slice %55 {offsets = [0, 0], sizes = [8, 32], strides = [1, 1]} : vector<8x128xf32> to vector<8x32xf32>
    %57 = vector.extract_strided_slice %55 {offsets = [0, 32], sizes = [8, 32], strides = [1, 1]} : vector<8x128xf32> to vector<8x32xf32>
    %58 = vector.extract_strided_slice %55 {offsets = [0, 64], sizes = [8, 32], strides = [1, 1]} : vector<8x128xf32> to vector<8x32xf32>
    %59 = vector.extract_strided_slice %55 {offsets = [0, 96], sizes = [8, 32], strides = [1, 1]} : vector<8x128xf32> to vector<8x32xf32>
    %60 = arith.mulf %57, %40 : vector<8x32xf32>
    %61 = arith.mulf %56, %58 : vector<8x32xf32>
    %62 = arith.addf %60, %61 : vector<8x32xf32>
    %63 = math.tanh %62 : vector<8x32xf32>
    %64 = arith.mulf %59, %63 : vector<8x32xf32>
    %65 = vector.extract_strided_slice %6 {offsets = [2, 0, 0], sizes = [1, 8, 128], strides = [1, 1, 1]} : vector<8x8x128xf32> to vector<1x8x128xf32>
    %66 = vector.shape_cast %65 : vector<1x8x128xf32> to vector<8x128xf32>
    %67 = arith.truncf %64 : vector<8x32xf32> to vector<8x32xbf16>
    %cst_17 = arith.constant dense<0.000000e+00> : vector<8x128xf32>
    %68 = tpu.matmul %67, %7, %cst_17 {dimension_numbers = #tpu.dot_dimension_numbers<[1], [0], [0], [1], [0, 0, 1, 1], [], []>} : vector<8x32xbf16>, vector<32x128xbf16>, vector<8x128xf32> -> vector<8x128xf32>
    %69 = arith.addf %66, %68 : vector<8x128xf32>
    %70 = arith.mulf %69, %16 : vector<8x128xf32>
    %71 = arith.negf %70 : vector<8x128xf32>
    %72 = math.exp %71 : vector<8x128xf32>
    %cst_18 = arith.constant 1.000000e+00 : f32
    %73 = vector.broadcast %cst_18 : f32 to vector<8x128xf32>
    %74 = arith.addf %73, %72 : vector<8x128xf32>
    %75 = arith.divf %73, %74 : vector<8x128xf32>
    %76 = arith.mulf %75, %19 : vector<8x128xf32>
    %77 = arith.addf %76, %22 : vector<8x128xf32>
    %78 = vector.extract_strided_slice %77 {offsets = [0, 0], sizes = [8, 32], strides = [1, 1]} : vector<8x128xf32> to vector<8x32xf32>
    %79 = vector.extract_strided_slice %77 {offsets = [0, 32], sizes = [8, 32], strides = [1, 1]} : vector<8x128xf32> to vector<8x32xf32>
    %80 = vector.extract_strided_slice %77 {offsets = [0, 64], sizes = [8, 32], strides = [1, 1]} : vector<8x128xf32> to vector<8x32xf32>
    %81 = vector.extract_strided_slice %77 {offsets = [0, 96], sizes = [8, 32], strides = [1, 1]} : vector<8x128xf32> to vector<8x32xf32>
    %82 = arith.mulf %79, %62 : vector<8x32xf32>
    %83 = arith.mulf %78, %80 : vector<8x32xf32>
    %84 = arith.addf %82, %83 : vector<8x32xf32>
    %85 = math.tanh %84 : vector<8x32xf32>
    %86 = arith.mulf %81, %85 : vector<8x32xf32>
    %87 = vector.extract_strided_slice %6 {offsets = [3, 0, 0], sizes = [1, 8, 128], strides = [1, 1, 1]} : vector<8x8x128xf32> to vector<1x8x128xf32>
    %88 = vector.shape_cast %87 : vector<1x8x128xf32> to vector<8x128xf32>
    %89 = arith.truncf %86 : vector<8x32xf32> to vector<8x32xbf16>
    %cst_19 = arith.constant dense<0.000000e+00> : vector<8x128xf32>
    %90 = tpu.matmul %89, %7, %cst_19 {dimension_numbers = #tpu.dot_dimension_numbers<[1], [0], [0], [1], [0, 0, 1, 1], [], []>} : vector<8x32xbf16>, vector<32x128xbf16>, vector<8x128xf32> -> vector<8x128xf32>
    %91 = arith.addf %88, %90 : vector<8x128xf32>
    %92 = arith.mulf %91, %16 : vector<8x128xf32>
    %93 = arith.negf %92 : vector<8x128xf32>
    %94 = math.exp %93 : vector<8x128xf32>
    %cst_20 = arith.constant 1.000000e+00 : f32
    %95 = vector.broadcast %cst_20 : f32 to vector<8x128xf32>
    %96 = arith.addf %95, %94 : vector<8x128xf32>
    %97 = arith.divf %95, %96 : vector<8x128xf32>
    %98 = arith.mulf %97, %19 : vector<8x128xf32>
    %99 = arith.addf %98, %22 : vector<8x128xf32>
    %100 = vector.extract_strided_slice %99 {offsets = [0, 0], sizes = [8, 32], strides = [1, 1]} : vector<8x128xf32> to vector<8x32xf32>
    %101 = vector.extract_strided_slice %99 {offsets = [0, 32], sizes = [8, 32], strides = [1, 1]} : vector<8x128xf32> to vector<8x32xf32>
    %102 = vector.extract_strided_slice %99 {offsets = [0, 64], sizes = [8, 32], strides = [1, 1]} : vector<8x128xf32> to vector<8x32xf32>
    %103 = vector.extract_strided_slice %99 {offsets = [0, 96], sizes = [8, 32], strides = [1, 1]} : vector<8x128xf32> to vector<8x32xf32>
    %104 = arith.mulf %101, %84 : vector<8x32xf32>
    %105 = arith.mulf %100, %102 : vector<8x32xf32>
    %106 = arith.addf %104, %105 : vector<8x32xf32>
    %107 = math.tanh %106 : vector<8x32xf32>
    %108 = arith.mulf %103, %107 : vector<8x32xf32>
    %109 = vector.extract_strided_slice %6 {offsets = [4, 0, 0], sizes = [1, 8, 128], strides = [1, 1, 1]} : vector<8x8x128xf32> to vector<1x8x128xf32>
    %110 = vector.shape_cast %109 : vector<1x8x128xf32> to vector<8x128xf32>
    %111 = arith.truncf %108 : vector<8x32xf32> to vector<8x32xbf16>
    %cst_21 = arith.constant dense<0.000000e+00> : vector<8x128xf32>
    %112 = tpu.matmul %111, %7, %cst_21 {dimension_numbers = #tpu.dot_dimension_numbers<[1], [0], [0], [1], [0, 0, 1, 1], [], []>} : vector<8x32xbf16>, vector<32x128xbf16>, vector<8x128xf32> -> vector<8x128xf32>
    %113 = arith.addf %110, %112 : vector<8x128xf32>
    %114 = arith.mulf %113, %16 : vector<8x128xf32>
    %115 = arith.negf %114 : vector<8x128xf32>
    %116 = math.exp %115 : vector<8x128xf32>
    %cst_22 = arith.constant 1.000000e+00 : f32
    %117 = vector.broadcast %cst_22 : f32 to vector<8x128xf32>
    %118 = arith.addf %117, %116 : vector<8x128xf32>
    %119 = arith.divf %117, %118 : vector<8x128xf32>
    %120 = arith.mulf %119, %19 : vector<8x128xf32>
    %121 = arith.addf %120, %22 : vector<8x128xf32>
    %122 = vector.extract_strided_slice %121 {offsets = [0, 0], sizes = [8, 32], strides = [1, 1]} : vector<8x128xf32> to vector<8x32xf32>
    %123 = vector.extract_strided_slice %121 {offsets = [0, 32], sizes = [8, 32], strides = [1, 1]} : vector<8x128xf32> to vector<8x32xf32>
    %124 = vector.extract_strided_slice %121 {offsets = [0, 64], sizes = [8, 32], strides = [1, 1]} : vector<8x128xf32> to vector<8x32xf32>
    %125 = vector.extract_strided_slice %121 {offsets = [0, 96], sizes = [8, 32], strides = [1, 1]} : vector<8x128xf32> to vector<8x32xf32>
    %126 = arith.mulf %123, %106 : vector<8x32xf32>
    %127 = arith.mulf %122, %124 : vector<8x32xf32>
    %128 = arith.addf %126, %127 : vector<8x32xf32>
    %129 = math.tanh %128 : vector<8x32xf32>
    %130 = arith.mulf %125, %129 : vector<8x32xf32>
    %131 = vector.extract_strided_slice %6 {offsets = [5, 0, 0], sizes = [1, 8, 128], strides = [1, 1, 1]} : vector<8x8x128xf32> to vector<1x8x128xf32>
    %132 = vector.shape_cast %131 : vector<1x8x128xf32> to vector<8x128xf32>
    %133 = arith.truncf %130 : vector<8x32xf32> to vector<8x32xbf16>
    %cst_23 = arith.constant dense<0.000000e+00> : vector<8x128xf32>
    %134 = tpu.matmul %133, %7, %cst_23 {dimension_numbers = #tpu.dot_dimension_numbers<[1], [0], [0], [1], [0, 0, 1, 1], [], []>} : vector<8x32xbf16>, vector<32x128xbf16>, vector<8x128xf32> -> vector<8x128xf32>
    %135 = arith.addf %132, %134 : vector<8x128xf32>
    %136 = arith.mulf %135, %16 : vector<8x128xf32>
    %137 = arith.negf %136 : vector<8x128xf32>
    %138 = math.exp %137 : vector<8x128xf32>
    %cst_24 = arith.constant 1.000000e+00 : f32
    %139 = vector.broadcast %cst_24 : f32 to vector<8x128xf32>
    %140 = arith.addf %139, %138 : vector<8x128xf32>
    %141 = arith.divf %139, %140 : vector<8x128xf32>
    %142 = arith.mulf %141, %19 : vector<8x128xf32>
    %143 = arith.addf %142, %22 : vector<8x128xf32>
    %144 = vector.extract_strided_slice %143 {offsets = [0, 0], sizes = [8, 32], strides = [1, 1]} : vector<8x128xf32> to vector<8x32xf32>
    %145 = vector.extract_strided_slice %143 {offsets = [0, 32], sizes = [8, 32], strides = [1, 1]} : vector<8x128xf32> to vector<8x32xf32>
    %146 = vector.extract_strided_slice %143 {offsets = [0, 64], sizes = [8, 32], strides = [1, 1]} : vector<8x128xf32> to vector<8x32xf32>
    %147 = vector.extract_strided_slice %143 {offsets = [0, 96], sizes = [8, 32], strides = [1, 1]} : vector<8x128xf32> to vector<8x32xf32>
    %148 = arith.mulf %145, %128 : vector<8x32xf32>
    %149 = arith.mulf %144, %146 : vector<8x32xf32>
    %150 = arith.addf %148, %149 : vector<8x32xf32>
    %151 = math.tanh %150 : vector<8x32xf32>
    %152 = arith.mulf %147, %151 : vector<8x32xf32>
    %153 = vector.extract_strided_slice %6 {offsets = [6, 0, 0], sizes = [1, 8, 128], strides = [1, 1, 1]} : vector<8x8x128xf32> to vector<1x8x128xf32>
    %154 = vector.shape_cast %153 : vector<1x8x128xf32> to vector<8x128xf32>
    %155 = arith.truncf %152 : vector<8x32xf32> to vector<8x32xbf16>
    %cst_25 = arith.constant dense<0.000000e+00> : vector<8x128xf32>
    %156 = tpu.matmul %155, %7, %cst_25 {dimension_numbers = #tpu.dot_dimension_numbers<[1], [0], [0], [1], [0, 0, 1, 1], [], []>} : vector<8x32xbf16>, vector<32x128xbf16>, vector<8x128xf32> -> vector<8x128xf32>
    %157 = arith.addf %154, %156 : vector<8x128xf32>
    %158 = arith.mulf %157, %16 : vector<8x128xf32>
    %159 = arith.negf %158 : vector<8x128xf32>
    %160 = math.exp %159 : vector<8x128xf32>
    %cst_26 = arith.constant 1.000000e+00 : f32
    %161 = vector.broadcast %cst_26 : f32 to vector<8x128xf32>
    %162 = arith.addf %161, %160 : vector<8x128xf32>
    %163 = arith.divf %161, %162 : vector<8x128xf32>
    %164 = arith.mulf %163, %19 : vector<8x128xf32>
    %165 = arith.addf %164, %22 : vector<8x128xf32>
    %166 = vector.extract_strided_slice %165 {offsets = [0, 0], sizes = [8, 32], strides = [1, 1]} : vector<8x128xf32> to vector<8x32xf32>
    %167 = vector.extract_strided_slice %165 {offsets = [0, 32], sizes = [8, 32], strides = [1, 1]} : vector<8x128xf32> to vector<8x32xf32>
    %168 = vector.extract_strided_slice %165 {offsets = [0, 64], sizes = [8, 32], strides = [1, 1]} : vector<8x128xf32> to vector<8x32xf32>
    %169 = vector.extract_strided_slice %165 {offsets = [0, 96], sizes = [8, 32], strides = [1, 1]} : vector<8x128xf32> to vector<8x32xf32>
    %170 = arith.mulf %167, %150 : vector<8x32xf32>
    %171 = arith.mulf %166, %168 : vector<8x32xf32>
    %172 = arith.addf %170, %171 : vector<8x32xf32>
    %173 = math.tanh %172 : vector<8x32xf32>
    %174 = arith.mulf %169, %173 : vector<8x32xf32>
    %175 = vector.extract_strided_slice %6 {offsets = [7, 0, 0], sizes = [1, 8, 128], strides = [1, 1, 1]} : vector<8x8x128xf32> to vector<1x8x128xf32>
    %176 = vector.shape_cast %175 : vector<1x8x128xf32> to vector<8x128xf32>
    %177 = arith.truncf %174 : vector<8x32xf32> to vector<8x32xbf16>
    %cst_27 = arith.constant dense<0.000000e+00> : vector<8x128xf32>
    %178 = tpu.matmul %177, %7, %cst_27 {dimension_numbers = #tpu.dot_dimension_numbers<[1], [0], [0], [1], [0, 0, 1, 1], [], []>} : vector<8x32xbf16>, vector<32x128xbf16>, vector<8x128xf32> -> vector<8x128xf32>
    %179 = arith.addf %176, %178 : vector<8x128xf32>
    %180 = arith.mulf %179, %16 : vector<8x128xf32>
    %181 = arith.negf %180 : vector<8x128xf32>
    %182 = math.exp %181 : vector<8x128xf32>
    %cst_28 = arith.constant 1.000000e+00 : f32
    %183 = vector.broadcast %cst_28 : f32 to vector<8x128xf32>
    %184 = arith.addf %183, %182 : vector<8x128xf32>
    %185 = arith.divf %183, %184 : vector<8x128xf32>
    %186 = arith.mulf %185, %19 : vector<8x128xf32>
    %187 = arith.addf %186, %22 : vector<8x128xf32>
    %188 = vector.extract_strided_slice %187 {offsets = [0, 0], sizes = [8, 32], strides = [1, 1]} : vector<8x128xf32> to vector<8x32xf32>
    %189 = vector.extract_strided_slice %187 {offsets = [0, 32], sizes = [8, 32], strides = [1, 1]} : vector<8x128xf32> to vector<8x32xf32>
    %190 = vector.extract_strided_slice %187 {offsets = [0, 64], sizes = [8, 32], strides = [1, 1]} : vector<8x128xf32> to vector<8x32xf32>
    %191 = vector.extract_strided_slice %187 {offsets = [0, 96], sizes = [8, 32], strides = [1, 1]} : vector<8x128xf32> to vector<8x32xf32>
    %192 = arith.mulf %189, %172 : vector<8x32xf32>
    %193 = arith.mulf %188, %190 : vector<8x32xf32>
    %194 = arith.addf %192, %193 : vector<8x32xf32>
    %195 = math.tanh %194 : vector<8x32xf32>
    %196 = arith.mulf %191, %195 : vector<8x32xf32>
    %197 = arith.truncf %196 : vector<8x32xf32> to vector<8x32xbf16>
    %c0_29 = arith.constant 0 : index
    %c0_30 = arith.constant 0 : index
    %198 = vector.load %arg4[%c0_29, %c0_30] : memref<32x128xbf16, #tpu.memory_space<vmem>>, vector<32x128xbf16>
    %cst_31 = arith.constant dense<0.000000e+00> : vector<8x128xf32>
    %199 = tpu.matmul %197, %198, %cst_31 {dimension_numbers = #tpu.dot_dimension_numbers<[1], [0], [0], [1], [0, 0, 1, 1], [], []>} : vector<8x32xbf16>, vector<32x128xbf16>, vector<8x128xf32> -> vector<8x128xf32>
    %c0_32 = arith.constant 0 : index
    %c0_33 = arith.constant 0 : index
    %200 = vector.load %arg5[%c0_32, %c0_33] : memref<1x128xf32, #tpu.memory_space<vmem>>, vector<1x128xf32>
    %201 = vector.broadcast %200 : vector<1x128xf32> to vector<8x128xf32>
    %202 = arith.addf %199, %201 : vector<8x128xf32>
    %c0_34 = arith.constant 0 : index
    %c0_35 = arith.constant 0 : index
    %203 = vector.load %arg6[%c0_34, %c0_35] : memref<8x128xf32, #tpu.memory_space<vmem>>, vector<8x128xf32>
    tpu.vector_store %arg6[%c0_34, %c0_35], %202 {strides = array<i32>} : memref<8x128xf32, #tpu.memory_space<vmem>>, vector<8x128xf32>,
    return
  }
}

</mosaic_0001>

<bundles_post_ra>
// kernel: tpu_custom_call.1
= control target key start
LH: loop header
LB: loop body
LE: loop exit
PB: predicated region body
PF: predicated region fallthrough
CT: control target
= control target key end

     0   :  { %vm68_vm0 = vcmask 130048   ;;  %s1243_s0 = inlined_call_operand.vmem [shape: bf16[64,16], index: 0, kind: input, shape index: {}]   ;;  %s1244_s1 = inlined_call_operand.vmem [shape: bf16[16,128], index: 1, kind: input, shape index: {}]   ;;  %s1245_s2 = inlined_call_operand.vmem [shape: bf16[32,128], index: 2, kind: input, shape index: {}]   ;;  %s1246_s3 = inlined_call_operand.vmem [shape: f32[1,128], index: 3, kind: input, shape index: {}]   ;;  %s1247_s4 = inlined_call_operand.vmem [shape: bf16[32,128], index: 4, kind: input, shape index: {}]   ;;  %s1248_s5 = inlined_call_operand.vmem [shape: f32[1,128], index: 5, kind: input, shape index: {}]   ;;  %s1249_s6 = inlined_call_operand.hbm [shape: f32[8,128], index: 6, kind: output, shape index: {}]  }
   0x1   :  { %v939_v0 = vld [vmem:[%s1244_s1] sm:$0xff]   ;;  %v941_v2 = vld [vmem:[%s1243_s0 + $0x8] sm:$0xff]  }
   0x2   :  { %v940_v1 = vld [vmem:[%s1243_s0] sm:$0xff]   ;;  %859 = vmatprep.subr.bf16.mxu0 %v939_v0 }
   0x3   :  { %860 = vmatpush3.bf16.msra.mxu0 %v939_v0  ;;  %861 = vmatprep.mubr.msk.bf16.mxu0 %vm68_vm0, %v940_v1 }
   0x6   :  { %862 = vmatmul.mubr.msk.bf16.vlgmr.msra.gmra.mxu0 %vm68_vm0, %v941_v2 }
   0x7   :  { %11 = vsyncpa [#allocation3], 0  ;;  %v1018_v3 = vmov 0.0   ;;  %v150_v4 = vlaneseq  ;;  %v1077_v7 = vld [vmem:[%s1246_s3] ss:$0 sm:$0xff]  ;;  %v1019_v9 = vmov 1.0  }
   0x8   :  { %869 = vmatprep.subr.bf16.mxu1 %v1018_v3  ;;  %885 = vmatprep.subr.bf16.mxu0 %v1018_v3  ;;  %s1020_s3 = smov 64   ;;  %s1021_s28 = smov 32   ;;  %v1093_v25 = vld [vmem:[%s1245_s2 + $0x8] sm:$0xff]   ;;  %vm1022_vm4 = vmmov 0   ;;  %v1101_v26 = vld [vmem:[%s1245_s2] sm:$0xff]   ;;  %vm199_vm5 = vcmask 261120  }
   0x9   :  { %v151_v5 = vand.u32 127, %v150_v4  ;;  %873 = vmatprep.mubr.msk.bf16.mxu1 %vm1022_vm4, %v1018_v3  ;;  %870 = vmatpush3.bf16.msra.mxu1 %v1093_v25  ;;  %s1023_s17 = smov [#allocation2]  }
   0xa   :  { %886 = vmatpush3.bf16.msra.mxu0 %v1093_v25  ;;  %871 = vmatprep.subr.bf16.mxu1 %v1018_v3 }
   0xb   :  { %vm152_vm1 = vcmp.ge.s32.totalorder %v151_v5, 64  ;;  %vm153_vm2 = vcmp.lt.s32.totalorder %v151_v5, 96  ;;  %887 = vmatprep.subr.bf16.mxu0 %v1018_v3 }
   0xc   :  { %vm154_vm3 = vmand %vm152_vm1, %vm153_vm2 }
   0xd   :  { %v1079_v10 = vsel %vm154_vm3, 2.0, %v1019_v9  ;;  %v1084_v17 = vsel %vm154_vm3, -1.0, %v1018_v3  ;;  %872 = vmatpush3.bf16.msra.mxu1 %v1101_v26 }
   0xe   :  { %888 = vmatpush3.bf16.msra.mxu0 %v1101_v26  ;;  %877 = vmatprep.subr.bf16.mxu1 %v1018_v3 }
   0xf   :  { %901 = vmatprep.subr.bf16.mxu0 %v1018_v3 }
  0xc6   :  { %v1072_v6 = vpop.f32.mrf.mxu0 }
  0xc7   :  { %v124_v57 = vadd.f32 %v1072_v6, %v1077_v7 }
  0xc8   :  { %v115_v8 = vpop.f32.mrf.mxu0 }
  0xc9   :  { %v116_v11 = vadd.f32 %v1077_v7, %v115_v8 }
  0xca   :  { %v1119_v32 = vpop.f32.mrf.mxu0 }
  0xcb   :  { %v157_v12 = vmul.f32 %v1079_v10, %v116_v11 }
  0xcc   :  { %v118_v33 = vpop.f32.mrf.mxu0 }
  0xcd   :  { %v809_v13 = vmul.f32 -1.442695, %v157_v12  ;;  %v119_v34 = vadd.f32 %v1077_v7, %v118_v33 }
  0xcf   :  { %948 = vpow2.f32 %v809_v13 }
  0xdc   :  { %v949_v14 = vpop.eup %948 }
  0xdd   :  { %v161_v15 = vadd.f32 1.0, %v949_v14  ;;  %v944_v14 = vld [vmem:[%s1243_s0 + $0x10] sm:$0xff]  }
  0xde   :  { %865 = vmatprep.mubr.msk.bf16.mxu0 %vm68_vm0, %v944_v14 }
  0xdf   :  { %950 = vrcp.f32 %v161_v15  ;;  %v945_v15 = vld [vmem:[%s1243_s0 + $0x18] sm:$0xff]  }
  0xe0   :  { %866 = vmatmul.mubr.msk.bf16.gmra.mxu0 %vm68_vm0, %v945_v15 }
  0xe1   :  { %889 = vmatprep.mubr.msk.bf16.mxu0 %vm1022_vm4, %v1018_v3 }
  0xec   :  { %v951_v16 = vpop.eup %950 }
  0xed   :  { %v164_v18 = vmul.f32 %v951_v16, %v1079_v10 }
  0xef   :  { %v165_v19 = vadd.f32 %v164_v18, %v1084_v17 }
  0xf1   :  { %168 = vrot.lane.b32.xlu0 %v165_v19, %s1020_s3  ;;  %v166_v22 = vmul.f32 0.0, %v165_v19 }
 0x163   :  { %v169_v20 = vpop.permute.xlu0 %168 }
 0x164   :  { %v171_v21 = vmul.f32 %v169_v20, %v165_v19 }
 0x166   :  { %173 = vrot.lane.b32.xlu0 %v171_v21, %s1021_s28 }
 0x1d8   :  { %v174_v23 = vpop.permute.xlu0 %173 }
 0x1d9   :  { %v176_v24 = vadd.f32 %v174_v23, %v166_v22  ;;  %v1162_v22 = vpop.f32.mrf.mxu0 }
 0x1db   :  { %952 = vtanh.f32 %v176_v24  ;;  %v131_v23 = vpop.f32.mrf.mxu0 }
 0x1e8   :  { %v953_v27 = vpop.eup %952 }
 0x1e9   :  { %179 = vrot.lane.b32.xlu1 %v953_v27, %s1020_s3 }
 0x25b   :  { %v180_v28 = vpop.permute.xlu1 %179 }
 0x25c   :  { %v182_v29 = vmul.f32 %v180_v28, %v165_v19  ;;  %v127_v28 = vadd.f32 %v1119_v32, %v1077_v7 }
 0x25e   :  { %v183_v30 = vpack.c.bf16 %v182_v29, %v182_v29 }
 0x260   :  { %185 = vrot.lane.b32.xlu1 %v183_v30, %s1021_s28 }
 0x2d2   :  { %v186_v31 = vpop.permute.xlu1 %185 }
 0x2d3   :  { %874 = vmatmul.mubr.msk.bf16.vlgmr.msra.gmra.mxu1 %vm199_vm5, %v186_v31 }
 0x2d4   :  { %878 = vmatpush3.bf16.msra.mxu1 %v1093_v25  ;;  %881 = vmatprep.mubr.msk.bf16.mxu1 %vm1022_vm4, %v1018_v3 }
 0x2d5   :  { %879 = vmatprep.subr.bf16.mxu1 %v1018_v3 }
 0x2d8   :  { %880 = vmatpush3.bf16.msra.mxu1 %v1101_v26 }
 0x2d9   :  { %893 = vmatprep.subr.bf16.mxu1 %v1018_v3 }
 0x393   :  { %v237_v35 = vpop.f32.mrf.mxu1 }
 0x394   :  { %v243_v36 = vadd.f32 %v237_v35, %v119_v34 }
 0x395   :  { %v875_v37 = vpop.f32.mrf.mxu1 }
 0x396   :  { %v244_v38 = vmul.f32 %v243_v36, %v1079_v10 }
 0x397   :  { %v240_v39 = vpop.f32.mrf.mxu1 }
 0x398   :  { %v813_v40 = vmul.f32 -1.442695, %v244_v38 }
 0x399   :  { %v876_v41 = vpop.f32.mrf.mxu1 }
 0x39a   :  { %954 = vpow2.f32 %v813_v40 }
 0x3a7   :  { %v955_v42 = vpop.eup %954 }
 0x3a8   :  { %v248_v43 = vadd.f32 1.0, %v955_v42 }
 0x3aa   :  { %956 = vrcp.f32 %v248_v43 }
 0x3b7   :  { %v957_v44 = vpop.eup %956 }
 0x3b8   :  { %v251_v45 = vmul.f32 %v957_v44, %v1079_v10 }
 0x3ba   :  { %v252_v46 = vadd.f32 %v251_v45, %v1084_v17 }
 0x3bc   :  { %255 = vrot.lane.b32.xlu0 %v252_v46, %s1020_s3  ;;  %v253_v49 = vmul.f32 %v252_v46, %v176_v24  ;;  %v1164_v24 = vpop.f32.mrf.mxu0 }
 0x3be   :  { %v1166_v27 = vpop.f32.mrf.mxu0 }
 0x42e   :  { %v256_v47 = vpop.permute.xlu0 %255 }
 0x42f   :  { %v258_v48 = vmul.f32 %v256_v47, %v252_v46 }
 0x431   :  { %260 = vrot.lane.b32.xlu1 %v258_v48, %s1021_s28 }
 0x4a3   :  { %v261_v50 = vpop.permute.xlu1 %260 }
 0x4a4   :  { %v263_v51 = vadd.f32 %v261_v50, %v253_v49 }
 0x4a6   :  { %958 = vtanh.f32 %v263_v51 }
 0x4b3   :  { %v959_v52 = vpop.eup %958 }
 0x4b4   :  { %266 = vrot.lane.b32.xlu0 %v959_v52, %s1020_s3 }
 0x526   :  { %v267_v53 = vpop.permute.xlu0 %266 }
 0x527   :  { %v269_v54 = vmul.f32 %v267_v53, %v252_v46 }
 0x529   :  { %v270_v55 = vpack.c.bf16 %v269_v54, %v269_v54 }
 0x52b   :  { %272 = vrot.lane.b32.xlu1 %v270_v55, %s1021_s28 }
 0x59d   :  { %v273_v56 = vpop.permute.xlu1 %272 }
 0x59e   :  { %882 = vmatmul.mubr.msk.bf16.vlgmr.msra.gmra.mxu1 %vm199_vm5, %v273_v56 }
 0x59f   :  { %894 = vmatpush3.bf16.msra.mxu1 %v1093_v25  ;;  %897 = vmatprep.mubr.msk.bf16.mxu1 %vm1022_vm4, %v1018_v3 }
 0x5a0   :  { %895 = vmatprep.subr.bf16.mxu1 %v1018_v3 }
 0x5a3   :  { %896 = vmatpush3.bf16.msra.mxu1 %v1101_v26 }
 0x5a4   :  { %909 = vmatprep.subr.bf16.mxu1 %v1018_v3 }
 0x65e   :  { %v311_v58 = vpop.f32.mrf.mxu1 }
 0x65f   :  { %v317_v59 = vadd.f32 %v311_v58, %v124_v57 }
 0x660   :  { %v883_v60 = vpop.f32.mrf.mxu1 }
 0x661   :  { %v318_v61 = vmul.f32 %v317_v59, %v1079_v10 }
 0x662   :  { %v314_v62 = vpop.f32.mrf.mxu1 }
 0x663   :  { %v815_v63 = vmul.f32 -1.442695, %v318_v61 }
 0x664   :  { %v884_v0 = vpop.f32.mrf.mxu1 }
 0x665   :  { %960 = vpow2.f32 %v815_v63 }
 0x672   :  { %v961_v1 = vpop.eup %960 }
 0x673   :  { %v322_v2 = vadd.f32 1.0, %v961_v1 }
 0x675   :  { %962 = vrcp.f32 %v322_v2 }
 0x682   :  { %v963_v4 = vpop.eup %962 }
 0x683   :  { %v325_v5 = vmul.f32 %v963_v4, %v1079_v10 }
 0x685   :  { %v326_v8 = vadd.f32 %v325_v5, %v1084_v17 }
 0x687   :  { %329 = vrot.lane.b32.xlu0 %v326_v8, %s1020_s3  ;;  %v327_v11 = vmul.f32 %v326_v8, %v263_v51  ;;  %v132_v51 = vadd.f32 %v1077_v7, %v131_v23 }
 0x6f9   :  { %v330_v6 = vpop.permute.xlu0 %329 }
 0x6fa   :  { %v332_v9 = vmul.f32 %v330_v6, %v326_v8 }
 0x6fc   :  { %334 = vrot.lane.b32.xlu1 %v332_v9, %s1021_s28 }
 0x76e   :  { %v335_v12 = vpop.permute.xlu1 %334 }
 0x76f   :  { %v337_v13 = vadd.f32 %v335_v12, %v327_v11 }
 0x771   :  { %964 = vtanh.f32 %v337_v13 }
 0x77e   :  { %v965_v16 = vpop.eup %964 }
 0x77f   :  { %340 = vrot.lane.b32.xlu0 %v965_v16, %s1020_s3 }
 0x7f1   :  { %v341_v18 = vpop.permute.xlu0 %340 }
 0x7f2   :  { %v343_v19 = vmul.f32 %v341_v18, %v326_v8 }
 0x7f4   :  { %v344_v20 = vpack.c.bf16 %v343_v19, %v343_v19 }
 0x7f6   :  { %346 = vrot.lane.b32.xlu1 %v344_v20, %s1021_s28 }
 0x868   :  { %v347_v21 = vpop.permute.xlu1 %346 }
 0x869   :  { %890 = vmatmul.mubr.msk.bf16.vlgmr.msra.gmra.mxu0 %vm199_vm5, %v347_v21 }
 0x86a   :  { %902 = vmatpush3.bf16.msra.mxu0 %v1093_v25  ;;  %905 = vmatprep.mubr.msk.bf16.mxu0 %vm1022_vm4, %v1018_v3 }
 0x86b   :  { %903 = vmatprep.subr.bf16.mxu0 %v1018_v3 }
 0x86e   :  { %904 = vmatpush3.bf16.msra.mxu0 %v1101_v26 }
 0x86f   :  { %917 = vmatprep.subr.bf16.mxu0 %v1018_v3 }
 0x929   :  { %v385_v29 = vpop.f32.mrf.mxu0 }
 0x92a   :  { %v391_v30 = vadd.f32 %v385_v29, %v127_v28 }
 0x92b   :  { %v891_v31 = vpop.f32.mrf.mxu0 }
 0x92c   :  { %v392_v33 = vmul.f32 %v391_v30, %v1079_v10 }
 0x92d   :  { %v388_v34 = vpop.f32.mrf.mxu0 }
 0x92e   :  { %v817_v35 = vmul.f32 -1.442695, %v392_v33 }
 0x92f   :  { %v892_v36 = vpop.f32.mrf.mxu0 }
 0x930   :  { %966 = vpow2.f32 %v817_v35 }
 0x93d   :  { %v967_v37 = vpop.eup %966 }
 0x93e   :  { %v396_v38 = vadd.f32 1.0, %v967_v37 }
 0x940   :  { %968 = vrcp.f32 %v396_v38 }
 0x94d   :  { %v969_v39 = vpop.eup %968 }
 0x94e   :  { %v399_v40 = vmul.f32 %v969_v39, %v1079_v10 }
 0x950   :  { %v400_v41 = vadd.f32 %v399_v40, %v1084_v17  ;;  %v140_v40 = vadd.f32 %v1162_v22, %v1077_v7 }
 0x952   :  { %403 = vrot.lane.b32.xlu0 %v400_v41, %s1020_s3  ;;  %v401_v43 = vmul.f32 %v400_v41, %v337_v13  ;;  %v135_v13 = vadd.f32 %v1077_v7, %v1166_v27 }
 0x9c4   :  { %v404_v32 = vpop.permute.xlu0 %403 }
 0x9c5   :  { %v406_v42 = vmul.f32 %v404_v32, %v400_v41 }
 0x9c7   :  { %408 = vrot.lane.b32.xlu1 %v406_v42, %s1021_s28 }
 0xa39   :  { %v409_v44 = vpop.permute.xlu1 %408 }
 0xa3a   :  { %v411_v45 = vadd.f32 %v409_v44, %v401_v43 }
 0xa3c   :  { %970 = vtanh.f32 %v411_v45 }
 0xa49   :  { %v971_v46 = vpop.eup %970 }
 0xa4a   :  { %414 = vrot.lane.b32.xlu0 %v971_v46, %s1020_s3 }
 0xabc   :  { %v415_v47 = vpop.permute.xlu0 %414 }
 0xabd   :  { %v417_v48 = vmul.f32 %v415_v47, %v400_v41 }
 0xabf   :  { %v418_v49 = vpack.c.bf16 %v417_v48, %v417_v48 }
 0xac1   :  { %420 = vrot.lane.b32.xlu1 %v418_v49, %s1021_s28 }
 0xb33   :  { %v421_v50 = vpop.permute.xlu1 %420 }
 0xb34   :  { %898 = vmatmul.mubr.msk.bf16.vlgmr.msra.gmra.mxu1 %vm199_vm5, %v421_v50 }
 0xb35   :  { %910 = vmatpush3.bf16.msra.mxu1 %v1093_v25  ;;  %913 = vmatprep.mubr.msk.bf16.mxu1 %vm1022_vm4, %v1018_v3 }
 0xb36   :  { %911 = vmatprep.subr.bf16.mxu1 %v1018_v3 }
 0xb39   :  { %912 = vmatpush3.bf16.msra.mxu1 %v1101_v26 }
 0xb3a   :  { %925 = vmatprep.subr.bf16.mxu1 %v1018_v3 }
 0xbf4   :  { %v459_v52 = vpop.f32.mrf.mxu1 }
 0xbf5   :  { %v465_v53 = vadd.f32 %v459_v52, %v132_v51 }
 0xbf6   :  { %v899_v54 = vpop.f32.mrf.mxu1 }
 0xbf7   :  { %v466_v55 = vmul.f32 %v465_v53, %v1079_v10 }
 0xbf8   :  { %v462_v56 = vpop.f32.mrf.mxu1 }
 0xbf9   :  { %v819_v57 = vmul.f32 -1.442695, %v466_v55 }
 0xbfa   :  { %v900_v58 = vpop.f32.mrf.mxu1 }
 0xbfb   :  { %972 = vpow2.f32 %v819_v57 }
 0xc08   :  { %v973_v59 = vpop.eup %972 }
 0xc09   :  { %v470_v60 = vadd.f32 1.0, %v973_v59 }
 0xc0b   :  { %974 = vrcp.f32 %v470_v60 }
 0xc18   :  { %v975_v61 = vpop.eup %974 }
 0xc19   :  { %v473_v62 = vmul.f32 %v975_v61, %v1079_v10  ;;  %v143_v61 = vadd.f32 %v1164_v24, %v1077_v7 }
 0xc1b   :  { %v474_v63 = vadd.f32 %v473_v62, %v1084_v17 }
 0xc1d   :  { %477 = vrot.lane.b32.xlu0 %v474_v63, %s1020_s3  ;;  %v475_v2 = vmul.f32 %v474_v63, %v411_v45 }
 0xc8f   :  { %v478_v0 = vpop.permute.xlu0 %477 }
 0xc90   :  { %v480_v1 = vmul.f32 %v478_v0, %v474_v63 }
 0xc92   :  { %482 = vrot.lane.b32.xlu1 %v480_v1, %s1021_s28 }
 0xd04   :  { %v483_v4 = vpop.permute.xlu1 %482 }
 0xd05   :  { %v485_v5 = vadd.f32 %v483_v4, %v475_v2 }
 0xd07   :  { %976 = vtanh.f32 %v485_v5 }
 0xd14   :  { %v977_v8 = vpop.eup %976 }
 0xd15   :  { %488 = vrot.lane.b32.xlu0 %v977_v8, %s1020_s3 }
 0xd87   :  { %v489_v6 = vpop.permute.xlu0 %488 }
 0xd88   :  { %v491_v9 = vmul.f32 %v489_v6, %v474_v63 }
 0xd8a   :  { %v492_v11 = vpack.c.bf16 %v491_v9, %v491_v9 }
 0xd8c   :  { %494 = vrot.lane.b32.xlu1 %v492_v11, %s1021_s28 }
 0xdfe   :  { %v495_v12 = vpop.permute.xlu1 %494 }
 0xdff   :  { %906 = vmatmul.mubr.msk.bf16.vlgmr.msra.gmra.mxu0 %vm199_vm5, %v495_v12 }
 0xe00   :  { %918 = vmatpush3.bf16.msra.mxu0 %v1093_v25  ;;  %921 = vmatprep.mubr.msk.bf16.mxu0 %vm1022_vm4, %v1018_v3 }
 0xe01   :  { %919 = vmatprep.subr.bf16.mxu0 %v1018_v3 }
 0xe04   :  { %920 = vmatpush3.bf16.msra.mxu0 %v1101_v26 }
 0xebf   :  { %v533_v14 = vpop.f32.mrf.mxu0 }
 0xec0   :  { %v539_v15 = vadd.f32 %v533_v14, %v135_v13 }
 0xec1   :  { %v907_v16 = vpop.f32.mrf.mxu0 }
 0xec2   :  { %v540_v18 = vmul.f32 %v539_v15, %v1079_v10  ;;  %v946_v16 = vld [vmem:[%s1247_s4 + $0x8] sm:$0xff]  }
 0xec3   :  { %v536_v19 = vpop.f32.mrf.mxu0 }
 0xec4   :  { %v821_v20 = vmul.f32 -1.442695, %v540_v18 }
 0xec5   :  { %v908_v21 = vpop.f32.mrf.mxu0 }
 0xec6   :  { %978 = vpow2.f32 %v821_v20 }
 0xed3   :  { %v979_v25 = vpop.eup %978 }
 0xed4   :  { %v544_v23 = vadd.f32 1.0, %v979_v25  ;;  %v826_v25 = vld [vmem:[%s1248_s5] ss:$0 sm:$0xff] }
 0xed6   :  { %980 = vrcp.f32 %v544_v23 }
 0xee3   :  { %v981_v28 = vpop.eup %980 }
 0xee4   :  { %v547_v29 = vmul.f32 %v981_v28, %v1079_v10 }
 0xee6   :  { %v548_v26 = vadd.f32 %v547_v29, %v1084_v17 }
 0xee8   :  { %551 = vrot.lane.b32.xlu0 %v548_v26, %s1020_s3  ;;  %v549_v31 = vmul.f32 %v548_v26, %v485_v5 }
 0xf5a   :  { %v552_v27 = vpop.permute.xlu0 %551 }
 0xf5b   :  { %v554_v30 = vmul.f32 %v552_v27, %v548_v26 }
 0xf5d   :  { %556 = vrot.lane.b32.xlu1 %v554_v30, %s1021_s28 }
 0xfcf   :  { %v557_v33 = vpop.permute.xlu1 %556 }
 0xfd0   :  { %v559_v34 = vadd.f32 %v557_v33, %v549_v31 }
 0xfd2   :  { %982 = vtanh.f32 %v559_v34 }
 0xfdf   :  { %v983_v35 = vpop.eup %982 }
 0xfe0   :  { %562 = vrot.lane.b32.xlu0 %v983_v35, %s1020_s3 }
0x1052   :  { %v563_v36 = vpop.permute.xlu0 %562 }
0x1053   :  { %v565_v37 = vmul.f32 %v563_v36, %v548_v26 }
0x1055   :  { %v566_v38 = vpack.c.bf16 %v565_v37, %v565_v37 }
0x1057   :  { %568 = vrot.lane.b32.xlu1 %v566_v38, %s1021_s28 }
0x10c9   :  { %v569_v39 = vpop.permute.xlu1 %568 }
0x10ca   :  { %914 = vmatmul.mubr.msk.bf16.vlgmr.msra.gmra.mxu1 %vm199_vm5, %v569_v39 }
0x10cb   :  { %929 = vmatprep.mubr.msk.bf16.mxu1 %vm1022_vm4, %v1018_v3  ;;  %926 = vmatpush3.bf16.msra.mxu1 %v946_v16 }
0x10cc   :  { %927 = vmatprep.subr.bf16.mxu1 %v1018_v3 }
0x118a   :  { %v607_v41 = vpop.f32.mrf.mxu1 }
0x118b   :  { %v613_v32 = vadd.f32 %v607_v41, %v140_v40 }
0x118c   :  { %v915_v42 = vpop.f32.mrf.mxu1 }
0x118d   :  { %v614_v43 = vmul.f32 %v613_v32, %v1079_v10 }
0x118e   :  { %v610_v44 = vpop.f32.mrf.mxu1 }
0x118f   :  { %v823_v45 = vmul.f32 -1.442695, %v614_v43 }
0x1190   :  { %v916_v46 = vpop.f32.mrf.mxu1 }
0x1191   :  { %984 = vpow2.f32 %v823_v45 }
0x119e   :  { %v985_v47 = vpop.eup %984 }
0x119f   :  { %v618_v48 = vadd.f32 1.0, %v985_v47 }
0x11a1   :  { %986 = vrcp.f32 %v618_v48 }
0x11ae   :  { %v987_v49 = vpop.eup %986 }
0x11af   :  { %v621_v50 = vmul.f32 %v987_v49, %v1079_v10 }
0x11b1   :  { %v622_v51 = vadd.f32 %v621_v50, %v1084_v17 }
0x11b3   :  { %625 = vrot.lane.b32.xlu0 %v622_v51, %s1020_s3  ;;  %v623_v53 = vmul.f32 %v622_v51, %v559_v34 }
0x1225   :  { %v626_v22 = vpop.permute.xlu0 %625 }
0x1226   :  { %v628_v52 = vmul.f32 %v626_v22, %v622_v51 }
0x1228   :  { %630 = vrot.lane.b32.xlu1 %v628_v52, %s1021_s28 }
0x129a   :  { %v631_v54 = vpop.permute.xlu1 %630 }
0x129b   :  { %v633_v55 = vadd.f32 %v631_v54, %v623_v53 }
0x129d   :  { %988 = vtanh.f32 %v633_v55 }
0x12aa   :  { %v989_v56 = vpop.eup %988 }
0x12ab   :  { %636 = vrot.lane.b32.xlu0 %v989_v56, %s1020_s3 }
0x131d   :  { %v637_v57 = vpop.permute.xlu0 %636 }
0x131e   :  { %v639_v58 = vmul.f32 %v637_v57, %v622_v51 }
0x1320   :  { %v640_v59 = vpack.c.bf16 %v639_v58, %v639_v58 }
0x1322   :  { %642 = vrot.lane.b32.xlu1 %v640_v59, %s1021_s28 }
0x1394   :  { %v643_v60 = vpop.permute.xlu1 %642 }
0x1395   :  { %922 = vmatmul.mubr.msk.bf16.vlgmr.msra.gmra.mxu0 %vm199_vm5, %v643_v60 }
0x1455   :  { %v681_v62 = vpop.f32.mrf.mxu0 }
0x1456   :  { %v687_v63 = vadd.f32 %v681_v62, %v143_v61 }
0x1457   :  { %v923_v0 = vpop.f32.mrf.mxu0 }
0x1458   :  { %v688_v1 = vmul.f32 %v687_v63, %v1079_v10 }
0x1459   :  { %v684_v2 = vpop.f32.mrf.mxu0 }
0x145a   :  { %v825_v4 = vmul.f32 -1.442695, %v688_v1 }
0x145b   :  { %v924_v5 = vpop.f32.mrf.mxu0 }
0x145c   :  { %990 = vpow2.f32 %v825_v4 }
0x1469   :  { %v991_v8 = vpop.eup %990 }
0x146a   :  { %v692_v6 = vadd.f32 1.0, %v991_v8 }
0x146c   :  { %992 = vrcp.f32 %v692_v6 }
0x1479   :  { %v993_v9 = vpop.eup %992 }
0x147a   :  { %v695_v11 = vmul.f32 %v993_v9, %v1079_v10  ;;  %v947_v10 = vld [vmem:[%s1247_s4] sm:$0xff]   ;;  %s791_s4 = sshll.u32 %s1023_s17, 4  ;;  %s792_s4 = int_to_ptr.vmem [resolvable:$true] %s791_s4 }
0x147b   :  { %928 = vmatpush3.bf16.msra.mxu1 %v947_v10  ;;  %s996_s18 = scalar_lea.vmem %s792_s4, 128  ;;  %p1001_p1 = scmp.lt.s32.totalorder %s792_s4, %s792_s4 }
0x147c   :  { %v696_v12 = vadd.f32 %v695_v11, %v1084_v17  ;;  %p997_p0 = scmp.ne.s32.totalorder %s792_s4, %s996_s18  ;;  %p1002_p2 = scmp.lt.s32.totalorder %s996_s18, %s996_s18 }
0x147e   :  { %699 = vrot.lane.b32.xlu0 %v696_v12, %s1020_s3  ;;  %v697_v13 = vmul.f32 %v696_v12, %v633_v55  ;;  %p1003_p3 = por %p1002_p2, %p1001_p1 }
0x1480   :  { %p1004_p4 = pnand %p1003_p3, %p997_p0 }
0x14f0   :  { %v700_v7 = vpop.permute.xlu0 %699 }
0x14f1   :  { %v702_v24 = vmul.f32 %v700_v7, %v696_v12 }
0x14f3   :  { %704 = vrot.lane.b32.xlu1 %v702_v24, %s1021_s28 }
0x1565   :  { %v705_v14 = vpop.permute.xlu1 %704 }
0x1566   :  { %v707_v15 = vadd.f32 %v705_v14, %v697_v13 }
0x1568   :  { %994 = vtanh.f32 %v707_v15 }
0x1575   :  { %v995_v17 = vpop.eup %994 }
0x1576   :  { %710 = vrot.lane.b32.xlu0 %v995_v17, %s1020_s3 }
0x15e8   :  { %v711_v18 = vpop.permute.xlu0 %710 }
0x15e9   :  { %v713_v19 = vmul.f32 %v711_v18, %v696_v12 }
0x15eb   :  { %v714_v20 = vpack.c.bf16 %v713_v19, %v713_v19 }
0x15ed   :  { %727 = vrot.lane.b32.xlu1 %v714_v20, %s1021_s28 }
0x165f   :  { %v728_v21 = vpop.permute.xlu1 %727 }
0x1660   :  { %930 = vmatmul.mubr.msk.bf16.vlgmr.msra.gmra.mxu1 %vm199_vm5, %v728_v21 }
0x1720   :  { %v778_v23 = vpop.f32.mrf.mxu1 }
0x1721   :  { %v779_v3 = vadd.f32 %v826_v25, %v778_v23 }
0x1722   :  { %v931_v28 = vpop.f32.mrf.mxu1 }
0x1723   :  { %784 = vst [vmem:[#allocation2] sm:$0xff] %v779_v3 }
0x1724   :  { %v781_v29 = vpop.f32.mrf.mxu1 }
0x1725   :  { %1007 = shalt.err (!%p1004_p4)
}
0x1726   :  { %794 = dma.vmem_to_hbm [thread:$0]  %s792_s4, 128, %s1249_s6, [#allocation3]   ;;  %v932_v26 = vpop.f32.mrf.mxu1 }
0x1727   :  { %1016 = dma.done.wait [#allocation3], 128  }
0x1728   :  { %1017 = vsyncadd [#allocation3], 4294967168 }
0x1729   :  { %798 = vsyncpa [#allocation3], 1 }

</bundles_post_ra>
